<compile_context>
chip_gen: v6e
topology: v6e:2x2x1
jax: 0.10.0
libtpu: 0.0.40
codegen_flags: <defaults>
</compile_context>

<pallas_src>
import functools

import jax
import jax.numpy as jnp
from jax.experimental import pallas as pl
from jax.experimental.pallas import tpu as pltpu


def _bn_stats_kernel(x_ref, mean_ref, var_ref, *, inv_l: float):
    """Accumulate per-channel sum / sum-of-squares; finalize to mean / biased var.

    mean_ref / var_ref are resident (C,1) output blocks (constant index map):
    they hold the running SUM and SUM-of-squares during the grid and are
    converted in place at the last grid step.
    """
    n = pl.program_id(0)
    t = pl.program_id(1)

    @pl.when((n == 0) & (t == 0))
    def _init():
        mean_ref[...] = jnp.zeros_like(mean_ref)
        var_ref[...] = jnp.zeros_like(var_ref)

    x = x_ref[0].astype(jnp.float32)                       # (C, hw_tile)
    mean_ref[...] += jnp.sum(x, axis=-1, keepdims=True)
    var_ref[...] += jnp.sum(x * x, axis=-1, keepdims=True)

    @pl.when((n == pl.num_programs(0) - 1) & (t == pl.num_programs(1) - 1))
    def _finalize():
        mean = mean_ref[...] * inv_l
        mean_ref[...] = mean
        var_ref[...] = var_ref[...] * inv_l - mean * mean  # biased variance


def _bn_norm_kernel(x_ref, scale_ref, shift_ref, o_ref):
    """y = x * scale + shift with per-channel (C,1) scale/shift."""
    x = x_ref[0].astype(jnp.float32)                       # (C, hw_tile)
    o_ref[0] = (x * scale_ref[...] + shift_ref[...]).astype(o_ref.dtype)


def _choose_hw_tile(hw: int, c: int, itemsize: int, budget: int = 2 << 20) -> int:
    """Largest tile over the H*W axis: full row if it fits the per-block budget,
    else the biggest multiple-of-128 divisor of hw that does."""
    if c * hw * itemsize <= budget:
        return hw
    t = max(128, ((budget // (c * itemsize)) // 128) * 128)
    while t >= 128:
        if hw % t == 0:
            return t
        t -= 128
    # TODO(synk): pad + mask the reduction instead of this full-row fallback
    # when H*W has no multiple-of-128 divisor under the VMEM budget.
    return hw


def my_batchnorm2d(x, weight, bias, running_mean, running_var, *,
                   eps: float = 1e-5, momentum: float = 0.9,
                   training: bool = True):
    """Forward of MyBatchNorm2d.

    x: (N, C, H, W).  Returns (y, new_running_mean, new_running_var).
    Running-buffer update follows F.batch_norm: new = (1-m)*old + m*batch.
    """
    N, C, H, W = x.shape
    HW = H * W
    L = N * HW

    if weight is None:          # affine=False
        weight = jnp.ones((C,), jnp.float32)
    if bias is None:
        bias = jnp.zeros((C,), jnp.float32)

    x3 = x.reshape(N, C, HW)    # free reshape, no transpose passes
    hw_tile = _choose_hw_tile(HW, C, x.dtype.itemsize)
    n_hw = HW // hw_tile
    block_bytes = C * hw_tile * x.dtype.itemsize
    vmem_limit = int(max(16 << 20, min(120 << 20, 8 * block_bytes)))

    if training:
        mean2, var2 = pl.pallas_call(
            functools.partial(_bn_stats_kernel, inv_l=1.0 / L),
            out_shape=(jax.ShapeDtypeStruct((C, 1), jnp.float32),
                       jax.ShapeDtypeStruct((C, 1), jnp.float32)),
            grid_spec=pltpu.PrefetchScalarGridSpec(
                num_scalar_prefetch=0,
                grid=(N, n_hw),
                in_specs=[pl.BlockSpec((1, C, hw_tile), lambda n, t: (n, 0, t))],
                out_specs=[pl.BlockSpec((C, 1), lambda n, t: (0, 0)),
                           pl.BlockSpec((C, 1), lambda n, t: (0, 0))]),
            compiler_params=pltpu.CompilerParams(
                dimension_semantics=("arbitrary", "arbitrary"),
                vmem_limit_bytes=vmem_limit),
        )(x3)
        mean = mean2[:, 0]                       # (C,) f32, batch mean
        var_b = var2[:, 0]                       # (C,) f32, biased batch var
    else:
        mean = running_mean.astype(jnp.float32)
        var_b = running_var.astype(jnp.float32)

    # Fold per-channel factors once (on (C,) vectors, not per element).
    inv = jax.lax.rsqrt(var_b + eps)
    scale = weight.astype(jnp.float32) * inv
    shift = bias.astype(jnp.float32) - mean * scale

    y3 = pl.pallas_call(
        _bn_norm_kernel,
        out_shape=jax.ShapeDtypeStruct((N, C, HW), x.dtype),
        grid_spec=pltpu.PrefetchScalarGridSpec(
            num_scalar_prefetch=0,
            grid=(N, n_hw),
            in_specs=[pl.BlockSpec((1, C, hw_tile), lambda n, t: (n, 0, t)),
                      pl.BlockSpec((C, 1), lambda n, t: (0, 0)),
                      pl.BlockSpec((C, 1), lambda n, t: (0, 0))],
            out_specs=pl.BlockSpec((1, C, hw_tile), lambda n, t: (n, 0, t))),
        compiler_params=pltpu.CompilerParams(
            dimension_semantics=("parallel", "parallel"),
            vmem_limit_bytes=vmem_limit),
    )(x3, scale.reshape(C, 1), shift.reshape(C, 1))

    y = y3.reshape(N, C, H, W)

    if not training:
        return y, running_mean, running_var

    # Running-buffer update from kernel-produced stats (no re-read of x).
    var_u = var_b * (L / max(L - 1, 1))          # unbiased; guard L == 1
    new_rm = (1.0 - momentum) * running_mean + momentum * mean
    new_rv = (1.0 - momentum) * running_var + momentum * var_u
    return y, new_rm.astype(running_mean.dtype), new_rv.astype(running_var.dtype)


if __name__ == "__main__":
    key = jax.random.PRNGKey(0)
    N, C, H, W = 2, 4, 16, 16

    x = jax.random.normal(key, (N, C, H, W), dtype=jnp.float32)

    # Deterministic parameter init, matching MyBatchNorm2d.__init__
    weight = jnp.ones((C,), dtype=jnp.float32)
    bias = jnp.zeros((C,), dtype=jnp.float32)
    running_mean = jnp.zeros((C,), dtype=jnp.float32)
    running_var = jnp.ones((C,), dtype=jnp.float32)

    y, new_rm, new_rv = my_batchnorm2d(
        x, weight, bias, running_mean, running_var,
        eps=1e-5, momentum=0.9, training=True)
    jax.block_until_ready((y, new_rm, new_rv))

    # Reference (pure JAX) training-mode batch norm
    mean_ref = jnp.mean(x, axis=(0, 2, 3), keepdims=True)
    var_ref = jnp.mean((x - mean_ref) ** 2, axis=(0, 2, 3), keepdims=True)
    y_ref = (x - mean_ref) / jnp.sqrt(var_ref + 1e-5) * weight[None, :, None, None] \
        + bias[None, :, None, None]

    assert y.shape == (N, C, H, W)
    assert jnp.allclose(y, y_ref, atol=5e-5, rtol=5e-5)

    # Reference running-buffer update (PyTorch convention of F.batch_norm)
    L = N * H * W
    rm_ref = 0.1 * running_mean + 0.9 * mean_ref.reshape(C)
    rv_ref = 0.1 * running_var + 0.9 * (var_ref.reshape(C) * L / (L - 1))
    assert jnp.allclose(new_rm, rm_ref, atol=5e-5, rtol=5e-5)
    assert jnp.allclose(new_rv, rv_ref, atol=5e-5, rtol=5e-5)

    # Eval path (running_mean=0, running_var=1): y ≈ x / sqrt(1 + eps)
    y_eval, _, _ = my_batchnorm2d(
        x, weight, bias, running_mean, running_var,
        eps=1e-5, momentum=0.9, training=False)
    jax.block_until_ready(y_eval)
    assert jnp.allclose(y_eval, x / jnp.sqrt(1.0 + 1e-5), atol=5e-5, rtol=5e-5)

    print("KERNEL_OK")
</pallas_src>

<mosaic_0001>
module attributes {stable_mosaic.version = 11 : i64} {
  func.func @_bn_stats_kernel(%arg0: i32, %arg1: i32, %arg2: memref<1x4x256xf32, #tpu.memory_space<vmem>>, %arg3: memref<4x1xf32, #tpu.memory_space<vmem>>, %arg4: memref<4x1xf32, #tpu.memory_space<vmem>>) attributes {dimension_semantics = [#tpu.dimension_semantics<arbitrary>, #tpu.dimension_semantics<arbitrary>], iteration_bounds = array<i64: 2, 1>, scalar_prefetch = 0 : i64, scratch_operands = 0 : i64, tpu.core_type = #tpu.core_type<tc>, window_params = [{transform_indices = @transform_0, window_bounds = array<i64: 1, 4, 256>}, {pipeline_mode = #tpu.pipeline_mode<synchronous>, transform_indices = @transform_1, window_bounds = array<i64: 4, 1>}, {pipeline_mode = #tpu.pipeline_mode<synchronous>, transform_indices = @transform_2, window_bounds = array<i64: 4, 1>}]} {
    %c0_i32 = arith.constant 0 : i32
    %0 = arith.cmpi eq, %arg0, %c0_i32 : i32
    %c0_i32_0 = arith.constant 0 : i32
    %1 = arith.cmpi eq, %arg1, %c0_i32_0 : i32
    %2 = arith.andi %0, %1 : i1
    %3 = arith.extui %2 : i1 to i32
    %c0_i32_1 = arith.constant 0 : i32
    %4 = arith.cmpi ne, %3, %c0_i32_1 : i32
    scf.if %4 {
      %cst_15 = arith.constant 0.000000e+00 : f32
      %23 = vector.broadcast %cst_15 : f32 to vector<4x1xf32>
      %c0_16 = arith.constant 0 : index
      %c0_17 = arith.constant 0 : index
      %24 = vector.load %arg3[%c0_16, %c0_17] : memref<4x1xf32, #tpu.memory_space<vmem>>, vector<4x1xf32>
      tpu.vector_store %arg3[%c0_16, %c0_17], %23 {strides = array<i32>} : memref<4x1xf32, #tpu.memory_space<vmem>>, vector<4x1xf32>,
      %cst_18 = arith.constant 0.000000e+00 : f32
      %25 = vector.broadcast %cst_18 : f32 to vector<4x1xf32>
      %c0_19 = arith.constant 0 : index
      %c0_20 = arith.constant 0 : index
      %26 = vector.load %arg4[%c0_19, %c0_20] : memref<4x1xf32, #tpu.memory_space<vmem>>, vector<4x1xf32>
      tpu.vector_store %arg4[%c0_19, %c0_20], %25 {strides = array<i32>} : memref<4x1xf32, #tpu.memory_space<vmem>>, vector<4x1xf32>,
    } else {
    }
    %c0 = arith.constant 0 : index
    %c0_2 = arith.constant 0 : index
    %c0_3 = arith.constant 0 : index
    %5 = vector.load %arg2[%c0, %c0_2, %c0_3] : memref<1x4x256xf32, #tpu.memory_space<vmem>>, vector<1x4x256xf32>
    %6 = vector.shape_cast %5 : vector<1x4x256xf32> to vector<4x256xf32>
    %c0_4 = arith.constant 0 : index
    %c0_5 = arith.constant 0 : index
    %7 = vector.load %arg3[%c0_4, %c0_5] : memref<4x1xf32, #tpu.memory_space<vmem>>, vector<4x1xf32>
    %cst = arith.constant dense<0.000000e+00> : vector<4xf32>
    %8 = vector.multi_reduction <add>, %6, %cst [1] : vector<4x256xf32> to vector<4xf32>
    %9 = vector.shape_cast %8 : vector<4xf32> to vector<4x1xf32>
    %10 = arith.addf %7, %9 : vector<4x1xf32>
    %c0_6 = arith.constant 0 : index
    %c0_7 = arith.constant 0 : index
    %11 = vector.load %arg3[%c0_6, %c0_7] : memref<4x1xf32, #tpu.memory_space<vmem>>, vector<4x1xf32>
    tpu.vector_store %arg3[%c0_6, %c0_7], %10 {strides = array<i32>} : memref<4x1xf32, #tpu.memory_space<vmem>>, vector<4x1xf32>,
    %c0_8 = arith.constant 0 : index
    %c0_9 = arith.constant 0 : index
    %12 = vector.load %arg4[%c0_8, %c0_9] : memref<4x1xf32, #tpu.memory_space<vmem>>, vector<4x1xf32>
    %13 = arith.mulf %6, %6 : vector<4x256xf32>
    %cst_10 = arith.constant dense<0.000000e+00> : vector<4xf32>
    %14 = vector.multi_reduction <add>, %13, %cst_10 [1] : vector<4x256xf32> to vector<4xf32>
    %15 = vector.shape_cast %14 : vector<4xf32> to vector<4x1xf32>
    %16 = arith.addf %12, %15 : vector<4x1xf32>
    %c0_11 = arith.constant 0 : index
    %c0_12 = arith.constant 0 : index
    %17 = vector.load %arg4[%c0_11, %c0_12] : memref<4x1xf32, #tpu.memory_space<vmem>>, vector<4x1xf32>
    tpu.vector_store %arg4[%c0_11, %c0_12], %16 {strides = array<i32>} : memref<4x1xf32, #tpu.memory_space<vmem>>, vector<4x1xf32>,
    %c1_i32 = arith.constant 1 : i32
    %18 = arith.cmpi eq, %arg0, %c1_i32 : i32
    %c0_i32_13 = arith.constant 0 : i32
    %19 = arith.cmpi eq, %arg1, %c0_i32_13 : i32
    %20 = arith.andi %18, %19 : i1
    %21 = arith.extui %20 : i1 to i32
    %c0_i32_14 = arith.constant 0 : i32
    %22 = arith.cmpi ne, %21, %c0_i32_14 : i32
    scf.if %22 {
      %c0_15 = arith.constant 0 : index
      %c0_16 = arith.constant 0 : index
      %23 = vector.load %arg3[%c0_15, %c0_16] : memref<4x1xf32, #tpu.memory_space<vmem>>, vector<4x1xf32>
      %cst_17 = arith.constant 0.001953125 : f32
      %24 = vector.broadcast %cst_17 : f32 to vector<4x1xf32>
      %25 = arith.mulf %23, %24 : vector<4x1xf32>
      %c0_18 = arith.constant 0 : index
      %c0_19 = arith.constant 0 : index
      %26 = vector.load %arg3[%c0_18, %c0_19] : memref<4x1xf32, #tpu.memory_space<vmem>>, vector<4x1xf32>
      tpu.vector_store %arg3[%c0_18, %c0_19], %25 {strides = array<i32>} : memref<4x1xf32, #tpu.memory_space<vmem>>, vector<4x1xf32>,
      %c0_20 = arith.constant 0 : index
      %c0_21 = arith.constant 0 : index
      %27 = vector.load %arg4[%c0_20, %c0_21] : memref<4x1xf32, #tpu.memory_space<vmem>>, vector<4x1xf32>
      %cst_22 = arith.constant 0.001953125 : f32
      %28 = vector.broadcast %cst_22 : f32 to vector<4x1xf32>
      %29 = arith.mulf %27, %28 : vector<4x1xf32>
      %30 = arith.mulf %25, %25 : vector<4x1xf32>
      %31 = arith.subf %29, %30 : vector<4x1xf32>
      %c0_23 = arith.constant 0 : index
      %c0_24 = arith.constant 0 : index
      %32 = vector.load %arg4[%c0_23, %c0_24] : memref<4x1xf32, #tpu.memory_space<vmem>>, vector<4x1xf32>
      tpu.vector_store %arg4[%c0_23, %c0_24], %31 {strides = array<i32>} : memref<4x1xf32, #tpu.memory_space<vmem>>, vector<4x1xf32>,
    } else {
    }
    return
  }
  func.func @transform_0(%arg0: i32, %arg1: i32) -> (i32, i32, i32) {
    %c0_i32 = arith.constant 0 : i32
    %c0_i32_0 = arith.constant 0 : i32
    return %arg0, %c0_i32, %arg1 : i32, i32, i32
  }
  func.func @transform_1(%arg0: i32, %arg1: i32) -> (i32, i32) {
    %c0_i32 = arith.constant 0 : i32
    %c0_i32_0 = arith.constant 0 : i32
    %c0_i32_1 = arith.constant 0 : i32
    return %c0_i32, %c0_i32_0 : i32, i32
  }
  func.func @transform_2(%arg0: i32, %arg1: i32) -> (i32, i32) {
    %c0_i32 = arith.constant 0 : i32
    %c0_i32_0 = arith.constant 0 : i32
    %c0_i32_1 = arith.constant 0 : i32
    return %c0_i32, %c0_i32_0 : i32, i32
  }
}

</mosaic_0001>

<bundles_post_ra>
// kernel: tpu_custom_call.1
= control target key start
LH: loop header
LB: loop body
LE: loop exit
PB: predicated region body
PF: predicated region fallthrough
CT: control target
= control target key end

     0   :  { %8 = vsyncpa [#allocation3], 0  ;;  %s567_s0 = inlined_call_operand.hbm [shape: f32[2,4,256], index: 0, kind: input, shape index: {}]   ;;  %s568_s1 = inlined_call_operand.vmem [shape: f32[4,1], index: 1, kind: output, shape index: {0}]   ;;  %s569_s2 = inlined_call_operand.vmem [shape: f32[4,1], index: 2, kind: output, shape index: {1}]  }
   0x1   :  { %10 = vsyncpa [#allocation3 + $0x1], 0  ;;  %s436_s9 = smov 0   ;;  %s438_s10 = smov 0  }
   0x2   :  { %s440_s11 = smov 0   ;;  %s442_s12 = smov 0  }
   0x3   :  { %s444_s13 = smov 0   ;;  %s446_s14 = smov 0  }
   0x4 LB: > { %s267_s15 = sadd.s32 4294967295, %s417_s14   ;;  %s28_s16 = sadd.s32 1, %s413_s13  ;;  %s417_s14 = sphi %s446_s14, %s16_s14   ;;  %s413_s13 = sphi %s444_s13, %s577_s13   ;;  %s409_s12 = sphi %s442_s12, %s576_s12   ;;  %s405_s11 = sphi %s440_s11, %s575_s11   ;;  %s401_s10 = sphi %s438_s10, %s574_s10   ;;  %s397_s9 = sphi %s436_s9, %s573_s9  }
   0x5   : > { %p30_p0 = scmp.ge.s32.totalorder %s28_s16, 2  ;;  %s37_s17 = sadd.s32 1, %s405_s11 }
   0x6   : > { %p44_p1 = scmp.ne.s32.totalorder %s405_s11, %s401_s10  ;;  %p45_p2 = scmp.eq.s32.totalorder %s417_s14, 0 }
   0x7   : > { %s579_s16 = smov (%p30_p0, %s28_s16), 0  ;;  %p50_p4 = scmp.ne.s32.totalorder %s401_s10, %s397_s9 }
   0x8   : > { %p472_p3 = por %p45_p2, %p44_p1  ;;  %s32_s19 = ssub.s32 %s413_s13, %s579_s16 }
   0x9   : > { %p51_p5 = scmp.eq.s32.totalorder %s267_s15, 0  ;;  %p35_p6 = scmp.eq.s32.totalorder %s32_s19, 0 }
   0xa   : > { %p288_p8 = scmp.lt.s32.totalorder %s417_s14, 2  ;;  %s116_s22 = sand.u32 1, %s405_s11  }
   0xb   : > { %p479_p7 = por %p51_p5, %p50_p4  ;;  %s279_s23 = sshll.u32 %s413_s13, 7 }
   0xc   : > { %s485_s21 = scalar_select %p35_p6, %s405_s11, %s37_s17  }
   0xd   : > { %s270_s24 = sshll.u32 %s116_s22, 3  ;;  %s128_s27 = scalar_lea.hbm %s567_s0, %s279_s23 }
   0xe   : > { %s120_s28 = scalar_lea.vmem [#allocation2], %s270_s24  ;;  %p494_p9 = pnand %p288_p8, %p472_p3 }
   0xf   : > { %s130_s29 = sshll.u32 %s120_s28, 4  ;;  %p273_p10 = scmp.ge.s32.totalorder %s417_s14, 1  ;;  %s131_s29 = int_to_ptr.vmem [resolvable:$true] %s130_s29 }
  0x10   : > { %p135_p11 = scmp.lt.s32.totalorder %s417_s14, 3  ;;  %s117_s3 = scalar_lea.sflag [#allocation3], %s116_s22 }
  0x11   : > { %p341_p12 = pneg %p494_p9  ;;  %s352_s4 = scalar_lea.vmem %s131_s29, 128 }
  0x12   : > { %p353_p13 = scmp.ne.s32.totalorder %s131_s29, %s352_s4  ;;  %s419_s5 = smov [#allocation2]  }
  0x13   : > { %s357_s6 = sshll.u32 %s419_s5, 4  ;;  %s358_s6 = int_to_ptr.vmem [resolvable:$false] %s357_s6 }
  0x14   : > { %p355_p0 = pnand %p353_p13, %p341_p12  ;;  %s359_s7 = scalar_lea.vmem %s358_s6, 256 }
  0x15   : > { %p360_p2 = scmp.lt.s32.totalorder %s131_s29, %s358_s6  ;;  %p361_p3 = scmp.lt.s32.totalorder %s359_s7, %s352_s4 }
  0x16   : > { %p356_p1 = pneg %p355_p0 }
  0x17   : > { %p362_p4 = por %p361_p3, %p360_p2 }
  0x19   : > { %p363_p5 = pnand %p362_p4, %p356_p1 }
  0x1b   : > { %366 = shalt.err (!%p363_p5)
}
  0x1c   : > { %287 = dma.hbm_to_vmem [thread:$0]  (!%p494_p9), %s128_s27, 128, %s131_s29, %s117_s3  }
  0x1d   : > { %p136_p6 = pnand %p273_p10, %p135_p11 }
  0x1e   : > { %s141_s8 = sand.u32 (!%p136_p6), 1, %s401_s10  }
  0x1f   : > { %139 = sbr.rel (%p136_p6) target bundleno = 207 (0xcf), region = 24  ;;  %s274_s9 = sshll.u32 (!%p136_p6), %s141_s8, 3 }
  0x20   : > { %s142_s15 = scalar_lea.sflag (!%p136_p6), [#allocation3], %s141_s8  ;;  %s145_s17 = scalar_lea.vmem (!%p136_p6), [#allocation2], %s274_s9 }
  0x24   : > { %392 = dma.done.wait (%p479_p7), %s142_s15, 128  }
  0x25   : > { %394 = vsyncadd (%p479_p7), %s142_s15, 4294967168  ;;  %p162_p8 = scmp.eq.s32.totalorder %s409_s12, 0 }
  0x26   : > { %vm168_vm0 = vcmask (%p162_p8), 3072   ;;  %v420_v0 = vmov (%p162_p8), 0.0  }
  0x27   : > { %167 = sbr.rel (!%p162_p8) target bundleno = 44 (0x2c), region = 32  ;;  %169 = vst.msk [vmem:[%s568_s1] sm:$0xf] (%p162_p8), %vm168_vm0, %v420_v0  ;;  %170 = vst.msk [vmem:[%s569_s2] sm:$0xf] (%p162_p8), %vm168_vm0, %v420_v0 }
  0x2c PF: > { %v171_v1 = vld [vmem:[%s145_s17] sm:$0xff]  ;;  %vm176_vm1 = vcmask 1043456   ;;  %p197_p7 = scmp.eq.s32.totalorder %s409_s12, 1  ;;  %vm183_vm2 = vcmask 3072  }
  0x2d   : > { %v174_v2 = vcombine.high %v171_v1, %v171_v1  ;;  %v177_v3 = vsel %vm176_vm1, %v171_v1, 0.0  ;;  %v186_v4 = vmul.f32 %v171_v1, %v171_v1 }
  0x2e   : > { %v172_v11 = vld [vmem:[%s568_s1] sm:$0xf] }
  0x2f   : > { %v178_v5 = vsel %vm176_vm1, %v174_v2, 0.0  ;;  %v188_v6 = vcombine.high %v186_v4, %v186_v4  ;;  %v190_v7 = vsel %vm176_vm1, %v186_v4, 0.0  ;;  %v185_v14 = vld [vmem:[%s569_s2] sm:$0xf] }
  0x30   : > { %v179_v8 = vadd.f32 %v178_v5, %v177_v3 }
  0x31   : > { %v191_v9 = vsel %vm176_vm1, %v188_v6, 0.0 }
  0x32   : > { %180 = vadd.xlane.f32.xlu0 %v179_v8  ;;  %v192_v10 = vadd.f32 %v191_v9, %v190_v7 }
  0x36   : > { %193 = vadd.xlane.f32.xlu0 %v192_v10 }
  0xbb   : > { %v181_v12 = vpop.xlane.xlu0 %180 }
  0xbc   : > { %v182_v13 = vadd.f32 %v181_v12, %v172_v11 }
  0xbe   : > { %184 = vst.msk [vmem:[%s568_s1] sm:$0xf] %vm183_vm2, %v182_v13  ;;  %201 = sbr.rel (!%p197_p7) target bundleno = 207 (0xcf), region = 36 }
  0xbf   : > { %v194_v15 = vpop.xlane.xlu0 %193 }
  0xc0   : > { %v195_v16 = vadd.f32 %v194_v15, %v185_v14 }
  0xc2   : > { %196 = vst.msk [vmem:[%s569_s2] sm:$0xf] %vm183_vm2, %v195_v16 }
  0xc5   : > { %v202_v17 = vld [vmem:[%s568_s1] sm:$0xf] }
  0xc6   : > { %v203_v19 = vmul.f32 0.001953125, %v202_v17 }
  0xc8   : > { %204 = vst.msk [vmem:[%s568_s1] sm:$0xf] %vm183_vm2, %v203_v19  ;;  %v207_v21 = vmul.f32 %v203_v19, %v203_v19 }
  0xc9   : > { %v205_v18 = vld [vmem:[%s569_s2] sm:$0xf] }
  0xca   : > { %v206_v20 = vmul.f32 0.001953125, %v205_v18 }
  0xcc   : > { %v208_v22 = vsub.f32 %v206_v20, %v207_v21 }
  0xce   : > { %209 = vst.msk [vmem:[%s569_s2] sm:$0xf] %vm183_vm2, %v208_v22 }
  0xcf PF: > { %s16_s14 = sadd.s32 1, %s417_s14   ;;  %s573_s9 = smov %s401_s10 }
  0xd0   : > { %p13_p9 = scmp.ge.s32.totalorder %s16_s14, 4   ;;  %s574_s10 = smov %s405_s11 }
  0xd1   : > { %s575_s11 = smov %s485_s21  ;;  %s576_s12 = smov %s413_s13 }
  0xd2   : > { %s577_s13 = smov %s579_s16  ;;  %15 = sbr.rel (!%p13_p9) target bundleno = 4 (0x4), region = 76 }
  0xd7   :  { %227 = vsyncpa [#allocation3], 1 }
  0xd8   :  { %229 = vsyncpa [#allocation3 + $0x1], 1 }

</bundles_post_ra>
